<compile_context>
chip_gen: v7x
topology: tpu7x:2x2x1
jax: 0.10.0
libtpu: 0.0.40
codegen_flags: <defaults>
</compile_context>

<pallas_src>
import functools

import jax
import jax.numpy as jnp
from jax import lax
from jax.experimental import pallas as pl
from jax.experimental.pallas import tpu as pltpu

_MiB = 1024 * 1024


# ---------------------------------------------------------------------------
# VMEM accounting & tile selection
# ---------------------------------------------------------------------------
def _round_up(x, m):
    return ((x + m - 1) // m) * m


def _sublane(itemsize):
    # sublane packing: 8 rows for 4-byte dtypes, 16 for 2-byte, 32 for 1-byte
    return max(8, 32 // max(1, itemsize))


def _padded_block_bytes(shape, itemsize):
    """VMEM footprint of a block including (sublane, 128)-lane tile padding."""
    dims = list(shape)
    dims[-1] = _round_up(dims[-1], 128)
    if len(dims) >= 2:
        dims[-2] = _round_up(dims[-2], _sublane(itemsize))
    n = itemsize
    for d in dims:
        n *= max(1, d)
    return n


def _vmem_limits(itemsize):
    """(scoped vmem limit, block budget) derived from the chip's physical VMEM."""
    try:
        cap = int(getattr(pltpu.get_tpu_info(), "vmem_capacity_bytes", 64 * _MiB))
    except Exception:  # conservative fallback (e.g. interpret mode)
        cap = 64 * _MiB
    # v7x (64 MiB/TC) -> ~48 MiB scoped; v5e/v6e (128 MiB) -> ~102 MiB scoped.
    limit = min(int(0.8 * cap), cap - 16 * _MiB)
    limit = max(32 * _MiB, min(limit, cap))
    budget = int(0.85 * limit)          # headroom for Mosaic internal scratch
    return limit, budget


def _divisors_desc(x):
    return [d for d in range(x, 0, -1) if x % d == 0]


def _block_footprint(cb, th, r, w_in, w_out, itemsize):
    """Double-buffered in+out blocks plus the transpose scratch, tile-padded."""
    narrow = _padded_block_bytes((1, cb, th, r * w_in), itemsize)       # (h_out, r*w_in) side
    planar = _padded_block_bytes((1, cb, r * r, th, w_out), itemsize)   # (r*r, h_out, w_out) side
    tbuf = _padded_block_bytes((w_in, th), itemsize)
    return 2 * narrow + 2 * planar + tbuf


def _pick_tiles(n, c, h_out, r, w_in, w_out, itemsize, budget):
    """Pick (cb, tile_h): the largest work-per-step slab whose padded footprint fits."""
    sub = _sublane(itemsize)
    th_cands = [h_out] + [d for d in _divisors_desc(h_out)
                          if d != h_out and d % sub == 0]
    cb_cands = _divisors_desc(c)

    best = None
    for th in th_cands:
        for cb in cb_cands:                      # descending -> first fit is largest cb
            if _block_footprint(cb, th, r, w_in, w_out, itemsize) <= budget:
                key = (cb * th, th)
                if best is None or key > best[0]:
                    best = (key, (cb, th))
                break
    if best is None:
        # Nothing fits even at the smallest tile; take the minimal slab and rely on the
        # raised scoped limit.  TODO(synk): add a W grid axis for pathological widths.
        return 1, min(th_cands)
    cb, th = best[1]

    # If the whole tensor became a single (large) grid step, split H (preferred) or C so
    # 2-TC chips (v7x) get parallel work.  Skip for tiny tensors where an extra ~0.35us
    # grid step would not pay for itself.
    step_bytes = 2 * cb * th * r * w_in * itemsize
    if n * (c // cb) * (h_out // th) == 1 and step_bytes >= (1 * _MiB):
        smaller_th = [d for d in _divisors_desc(h_out) if d < th and d % sub == 0]
        if smaller_th:
            th = smaller_th[0]
        else:
            smaller_cb = [d for d in _divisors_desc(c) if d < c]
            if smaller_cb:
                cb = smaller_cb[0]
    return cb, th


# ---------------------------------------------------------------------------
# Kernels
# ---------------------------------------------------------------------------
def _for_each_channel(cb, body, unroll):
    """Static unroll for small channel batches, (partially unrolled) fori_loop else."""
    if cb <= 8:
        for cc in range(cb):
            body(cc)
    else:
        def wrapped(cc, carry):
            body(cc)
            return carry
        lax.fori_loop(0, cb, wrapped, 0, unroll=unroll)


def _squeeze_kernel(x_ref, o_ref, tbuf, *, r, w_in, w_out, cb, unroll):
    # x_ref: (1, cb, tile_h, r*w_in) -- row m holds input rows m*r .. m*r+r-1 concatenated
    # o_ref: (1, cb, r*r, tile_h, w_out)
    # tbuf : (w_in, tile_h) VMEM scratch (reused per channel / per i)
    def per_channel(cc):
        for i in range(r):
            # rows i::r of the original image: a contiguous lane slice of the ref view
            xi = x_ref[0, cc, :, i * w_in:(i + 1) * w_in]        # (tile_h, w_in)
            tbuf[...] = xi.T                                      # (w_in, tile_h)
            for j in range(r):
                # columns j::r of xi == sublane-strided rows of tbuf
                xij_t = tbuf[pl.ds(j, w_out, stride=r), :]        # (w_out, tile_h)
                o_ref[0, cc, i * r + j, :, :] = xij_t.T           # (tile_h, w_out)

    _for_each_channel(cb, per_channel, unroll)


def _unsqueeze_kernel(y_ref, o_ref, tbuf, *, r, w_in, w_out, cb, unroll):
    # y_ref: (1, cb, r*r, tile_h, w_out)
    # o_ref: (1, cb, tile_h, r*w_in)
    # tbuf : (w_in, tile_h) VMEM scratch
    def per_channel(cc):
        for i in range(r):
            for j in range(r):
                plane = y_ref[0, cc, i * r + j, :, :]             # (tile_h, w_out)
                tbuf[pl.ds(j, w_out, stride=r), :] = plane.T      # interleave along sublanes
            o_ref[0, cc, :, i * w_in:(i + 1) * w_in] = tbuf[...].T  # (tile_h, w_in)

    _for_each_channel(cb, per_channel, unroll)


# ---------------------------------------------------------------------------
# Wrappers (glue: pure reshapes only)
# ---------------------------------------------------------------------------
def pallas_squeeze(x, downscale_factor=2):
    """[N, C, H*r, W*r] -> [N, C*r^2, H, W]"""
    r = int(downscale_factor)
    n, c, h_in, w_in = x.shape
    assert h_in % r == 0 and w_in % r == 0
    h_out, w_out = h_in // r, w_in // r
    itemsize = jnp.dtype(x.dtype).itemsize

    vmem_limit, budget = _vmem_limits(itemsize)
    cb, tile_h = _pick_tiles(n, c, h_out, r, w_in, w_out, itemsize, budget)
    unroll = 8 if tile_h * r * w_in * itemsize <= 256 * 1024 else 1

    xr = x.reshape(n, c, h_out, r * w_in)                  # pure reshape
    kernel = functools.partial(_squeeze_kernel, r=r, w_in=w_in, w_out=w_out,
                               cb=cb, unroll=unroll)
    out = pl.pallas_call(
        kernel,
        out_shape=jax.ShapeDtypeStruct((n, c, r * r, h_out, w_out), x.dtype),
        grid_spec=pltpu.PrefetchScalarGridSpec(
            num_scalar_prefetch=0,
            grid=(n, c // cb, h_out // tile_h),
            in_specs=[pl.BlockSpec((1, cb, tile_h, r * w_in),
                                   lambda b, cg, hg: (b, cg, hg, 0))],
            out_specs=pl.BlockSpec((1, cb, r * r, tile_h, w_out),
                                   lambda b, cg, hg: (b, cg, 0, hg, 0)),
            scratch_shapes=[pltpu.VMEM((w_in, tile_h), x.dtype)],
        ),
        compiler_params=pltpu.CompilerParams(
            dimension_semantics=("parallel", "parallel", "parallel"),
            vmem_limit_bytes=vmem_limit),
        cost_estimate=pl.CostEstimate(flops=0, transcendentals=0,
                                      bytes_accessed=2 * x.size * itemsize),
    )(xr)
    return out.reshape(n, c * r * r, h_out, w_out)         # pure reshape


def pallas_unsqueeze(y, upscale_factor=2):
    """[N, C*r^2, H, W] -> [N, C, H*r, W*r]"""
    r = int(upscale_factor)
    n, c_rr, h_out, w_out = y.shape
    assert c_rr % (r * r) == 0
    c = c_rr // (r * r)
    w_in, h_in = w_out * r, h_out * r
    itemsize = jnp.dtype(y.dtype).itemsize

    vmem_limit, budget = _vmem_limits(itemsize)
    cb, tile_h = _pick_tiles(n, c, h_out, r, w_in, w_out, itemsize, budget)
    unroll = 8 if tile_h * r * w_in * itemsize <= 256 * 1024 else 1

    yr = y.reshape(n, c, r * r, h_out, w_out)              # pure reshape
    kernel = functools.partial(_unsqueeze_kernel, r=r, w_in=w_in, w_out=w_out,
                               cb=cb, unroll=unroll)
    out = pl.pallas_call(
        kernel,
        out_shape=jax.ShapeDtypeStruct((n, c, h_out, r * w_in), y.dtype),
        grid_spec=pltpu.PrefetchScalarGridSpec(
            num_scalar_prefetch=0,
            grid=(n, c // cb, h_out // tile_h),
            in_specs=[pl.BlockSpec((1, cb, r * r, tile_h, w_out),
                                   lambda b, cg, hg: (b, cg, 0, hg, 0))],
            out_specs=pl.BlockSpec((1, cb, tile_h, r * w_in),
                                   lambda b, cg, hg: (b, cg, hg, 0)),
            scratch_shapes=[pltpu.VMEM((w_in, tile_h), y.dtype)],
        ),
        compiler_params=pltpu.CompilerParams(
            dimension_semantics=("parallel", "parallel", "parallel"),
            vmem_limit_bytes=vmem_limit),
        cost_estimate=pl.CostEstimate(flops=0, transcendentals=0,
                                      bytes_accessed=2 * y.size * itemsize),
    )(yr)
    return out.reshape(n, c, h_in, w_in)                   # pure reshape


class SqueezeLayer:
    """Pallas-backed equivalent of the PyTorch SqueezeLayer (no parameters)."""

    def __init__(self, downscale_factor):
        self.downscale_factor = downscale_factor

    def __call__(self, x, logpx=None, reverse=False):
        if reverse:
            y = pallas_unsqueeze(x, self.downscale_factor)
        else:
            y = pallas_squeeze(x, self.downscale_factor)
        return y if logpx is None else (y, logpx)


# ---------------------------------------------------------------------------
# Pure-JAX references (for correctness checks only)
# ---------------------------------------------------------------------------
def _squeeze_ref(x, r=2):
    n, c, h, w = x.shape
    xv = x.reshape(n, c, h // r, r, w // r, r)
    return jnp.transpose(xv, (0, 1, 3, 5, 2, 4)).reshape(n, c * r * r, h // r, w // r)


def _unsqueeze_ref(y, r=2):
    n, c_rr, h, w = y.shape
    c = c_rr // (r * r)
    yv = y.reshape(n, c, r, r, h, w)
    return jnp.transpose(yv, (0, 1, 4, 2, 5, 3)).reshape(n, c, h * r, w * r)


if __name__ == "__main__":
    key = jax.random.PRNGKey(0)
    x = jax.random.normal(key, (2, 4, 16, 16), dtype=jnp.float32)

    layer = SqueezeLayer(downscale_factor=2)

    # forward (squeeze)
    y = layer(x)
    jax.block_until_ready(y)
    assert y.shape == (2, 16, 8, 8)
    assert bool(jnp.array_equal(y, _squeeze_ref(x, 2)))

    # forward with logpx pass-through
    logpx = jnp.zeros((2, 1), dtype=jnp.float32)
    y2, lp = layer(x, logpx)
    jax.block_until_ready(y2)
    assert bool(jnp.array_equal(y2, y)) and bool(jnp.array_equal(lp, logpx))

    # reverse (unsqueeze) — round trip
    x_rt = layer(y, reverse=True)
    jax.block_until_ready(x_rt)
    assert x_rt.shape == x.shape
    assert bool(jnp.array_equal(x_rt, x))
    assert bool(jnp.array_equal(x_rt, _unsqueeze_ref(y, 2)))

    # second case: N=1, odd channel count (exercises cb/tile_h divisor selection)
    x3 = jax.random.normal(jax.random.PRNGKey(1), (1, 6, 8, 8), dtype=jnp.float32)
    y3 = layer(x3)
    jax.block_until_ready(y3)
    assert y3.shape == (1, 24, 4, 4)
    assert bool(jnp.array_equal(y3, _squeeze_ref(x3, 2)))
    x3_rt = layer(y3, reverse=True)
    jax.block_until_ready(x3_rt)
    assert bool(jnp.array_equal(x3_rt, x3))

    print("KERNEL_OK")
</pallas_src>

<mosaic_0001>
module attributes {stable_mosaic.version = 11 : i64} {
  func.func @_squeeze_kernel(%arg0: i32, %arg1: i32, %arg2: i32, %arg3: memref<1x4x8x32xf32, #tpu.memory_space<vmem>>, %arg4: memref<1x4x4x8x8xf32, #tpu.memory_space<vmem>>, %arg5: memref<16x8xf32, #tpu.memory_space<vmem>>) attributes {dimension_semantics = [#tpu.dimension_semantics<parallel>, #tpu.dimension_semantics<parallel>, #tpu.dimension_semantics<parallel>], iteration_bounds = array<i64: 2, 1, 1>, scalar_prefetch = 0 : i64, scratch_operands = 1 : i64, tpu.core_type = #tpu.core_type<tc>, window_params = [{transform_indices = @transform_0, window_bounds = array<i64: 1, 4, 8, 32>}, {transform_indices = @transform_1, window_bounds = array<i64: 1, 4, 4, 8, 8>}]} {
    %c0 = arith.constant 0 : index
    %c0_0 = arith.constant 0 : index
    %c0_1 = arith.constant 0 : index
    %c0_2 = arith.constant 0 : index
    %0 = vector.load %arg3[%c0, %c0_0, %c0_1, %c0_2] : memref<1x4x8x32xf32, #tpu.memory_space<vmem>>, vector<1x1x8x16xf32>
    %1 = vector.shape_cast %0 : vector<1x1x8x16xf32> to vector<8x16xf32>
    %2 = tpu.transpose %1, [1, 0] : vector<8x16xf32> -> vector<16x8xf32>
    %c0_3 = arith.constant 0 : index
    %c0_4 = arith.constant 0 : index
    %3 = vector.load %arg5[%c0_3, %c0_4] : memref<16x8xf32, #tpu.memory_space<vmem>>, vector<16x8xf32>
    tpu.vector_store %arg5[%c0_3, %c0_4], %2 {strides = array<i32>} : memref<16x8xf32, #tpu.memory_space<vmem>>, vector<16x8xf32>,
    %c0_5 = arith.constant 0 : index
    %c0_6 = arith.constant 0 : index
    %4 = tpu.strided_load %arg5[%c0_5, %c0_6] {strides = array<i32: 2, 1>} : memref<16x8xf32, #tpu.memory_space<vmem>>, vector<8x8xf32>
    %5 = tpu.transpose %4, [1, 0] : vector<8x8xf32> -> vector<8x8xf32>
    %c0_7 = arith.constant 0 : index
    %c0_8 = arith.constant 0 : index
    %c0_9 = arith.constant 0 : index
    %c0_10 = arith.constant 0 : index
    %c0_11 = arith.constant 0 : index
    %6 = vector.load %arg4[%c0_7, %c0_8, %c0_9, %c0_10, %c0_11] : memref<1x4x4x8x8xf32, #tpu.memory_space<vmem>>, vector<1x1x1x8x8xf32>
    %7 = vector.shape_cast %6 : vector<1x1x1x8x8xf32> to vector<8x8xf32>
    %8 = vector.shape_cast %5 : vector<8x8xf32> to vector<1x1x1x8x8xf32>
    tpu.vector_store %arg4[%c0_7, %c0_8, %c0_9, %c0_10, %c0_11], %8 {strides = array<i32>} : memref<1x4x4x8x8xf32, #tpu.memory_space<vmem>>, vector<1x1x1x8x8xf32>,
    %c1 = arith.constant 1 : index
    %c0_12 = arith.constant 0 : index
    %9 = tpu.strided_load %arg5[%c1, %c0_12] {strides = array<i32: 2, 1>} : memref<16x8xf32, #tpu.memory_space<vmem>>, vector<8x8xf32>
    %10 = tpu.transpose %9, [1, 0] : vector<8x8xf32> -> vector<8x8xf32>
    %c0_13 = arith.constant 0 : index
    %c0_14 = arith.constant 0 : index
    %c1_15 = arith.constant 1 : index
    %c0_16 = arith.constant 0 : index
    %c0_17 = arith.constant 0 : index
    %11 = vector.load %arg4[%c0_13, %c0_14, %c1_15, %c0_16, %c0_17] : memref<1x4x4x8x8xf32, #tpu.memory_space<vmem>>, vector<1x1x1x8x8xf32>
    %12 = vector.shape_cast %11 : vector<1x1x1x8x8xf32> to vector<8x8xf32>
    %13 = vector.shape_cast %10 : vector<8x8xf32> to vector<1x1x1x8x8xf32>
    tpu.vector_store %arg4[%c0_13, %c0_14, %c1_15, %c0_16, %c0_17], %13 {strides = array<i32>} : memref<1x4x4x8x8xf32, #tpu.memory_space<vmem>>, vector<1x1x1x8x8xf32>,
    %c0_18 = arith.constant 0 : index
    %c0_19 = arith.constant 0 : index
    %c0_20 = arith.constant 0 : index
    %c16 = arith.constant 16 : index
    %14 = vector.load %arg3[%c0_18, %c0_19, %c0_20, %c16] : memref<1x4x8x32xf32, #tpu.memory_space<vmem>>, vector<1x1x8x16xf32>
    %15 = vector.shape_cast %14 : vector<1x1x8x16xf32> to vector<8x16xf32>
    %16 = tpu.transpose %15, [1, 0] : vector<8x16xf32> -> vector<16x8xf32>
    %c0_21 = arith.constant 0 : index
    %c0_22 = arith.constant 0 : index
    %17 = vector.load %arg5[%c0_21, %c0_22] : memref<16x8xf32, #tpu.memory_space<vmem>>, vector<16x8xf32>
    tpu.vector_store %arg5[%c0_21, %c0_22], %16 {strides = array<i32>} : memref<16x8xf32, #tpu.memory_space<vmem>>, vector<16x8xf32>,
    %c0_23 = arith.constant 0 : index
    %c0_24 = arith.constant 0 : index
    %18 = tpu.strided_load %arg5[%c0_23, %c0_24] {strides = array<i32: 2, 1>} : memref<16x8xf32, #tpu.memory_space<vmem>>, vector<8x8xf32>
    %19 = tpu.transpose %18, [1, 0] : vector<8x8xf32> -> vector<8x8xf32>
    %c0_25 = arith.constant 0 : index
    %c0_26 = arith.constant 0 : index
    %c2 = arith.constant 2 : index
    %c0_27 = arith.constant 0 : index
    %c0_28 = arith.constant 0 : index
    %20 = vector.load %arg4[%c0_25, %c0_26, %c2, %c0_27, %c0_28] : memref<1x4x4x8x8xf32, #tpu.memory_space<vmem>>, vector<1x1x1x8x8xf32>
    %21 = vector.shape_cast %20 : vector<1x1x1x8x8xf32> to vector<8x8xf32>
    %22 = vector.shape_cast %19 : vector<8x8xf32> to vector<1x1x1x8x8xf32>
    tpu.vector_store %arg4[%c0_25, %c0_26, %c2, %c0_27, %c0_28], %22 {strides = array<i32>} : memref<1x4x4x8x8xf32, #tpu.memory_space<vmem>>, vector<1x1x1x8x8xf32>,
    %c1_29 = arith.constant 1 : index
    %c0_30 = arith.constant 0 : index
    %23 = tpu.strided_load %arg5[%c1_29, %c0_30] {strides = array<i32: 2, 1>} : memref<16x8xf32, #tpu.memory_space<vmem>>, vector<8x8xf32>
    %24 = tpu.transpose %23, [1, 0] : vector<8x8xf32> -> vector<8x8xf32>
    %c0_31 = arith.constant 0 : index
    %c0_32 = arith.constant 0 : index
    %c3 = arith.constant 3 : index
    %c0_33 = arith.constant 0 : index
    %c0_34 = arith.constant 0 : index
    %25 = vector.load %arg4[%c0_31, %c0_32, %c3, %c0_33, %c0_34] : memref<1x4x4x8x8xf32, #tpu.memory_space<vmem>>, vector<1x1x1x8x8xf32>
    %26 = vector.shape_cast %25 : vector<1x1x1x8x8xf32> to vector<8x8xf32>
    %27 = vector.shape_cast %24 : vector<8x8xf32> to vector<1x1x1x8x8xf32>
    tpu.vector_store %arg4[%c0_31, %c0_32, %c3, %c0_33, %c0_34], %27 {strides = array<i32>} : memref<1x4x4x8x8xf32, #tpu.memory_space<vmem>>, vector<1x1x1x8x8xf32>,
    %c0_35 = arith.constant 0 : index
    %c1_36 = arith.constant 1 : index
    %c0_37 = arith.constant 0 : index
    %c0_38 = arith.constant 0 : index
    %28 = vector.load %arg3[%c0_35, %c1_36, %c0_37, %c0_38] : memref<1x4x8x32xf32, #tpu.memory_space<vmem>>, vector<1x1x8x16xf32>
    %29 = vector.shape_cast %28 : vector<1x1x8x16xf32> to vector<8x16xf32>
    %30 = tpu.transpose %29, [1, 0] : vector<8x16xf32> -> vector<16x8xf32>
    %c0_39 = arith.constant 0 : index
    %c0_40 = arith.constant 0 : index
    %31 = vector.load %arg5[%c0_39, %c0_40] : memref<16x8xf32, #tpu.memory_space<vmem>>, vector<16x8xf32>
    tpu.vector_store %arg5[%c0_39, %c0_40], %30 {strides = array<i32>} : memref<16x8xf32, #tpu.memory_space<vmem>>, vector<16x8xf32>,
    %c0_41 = arith.constant 0 : index
    %c0_42 = arith.constant 0 : index
    %32 = tpu.strided_load %arg5[%c0_41, %c0_42] {strides = array<i32: 2, 1>} : memref<16x8xf32, #tpu.memory_space<vmem>>, vector<8x8xf32>
    %33 = tpu.transpose %32, [1, 0] : vector<8x8xf32> -> vector<8x8xf32>
    %c0_43 = arith.constant 0 : index
    %c1_44 = arith.constant 1 : index
    %c0_45 = arith.constant 0 : index
    %c0_46 = arith.constant 0 : index
    %c0_47 = arith.constant 0 : index
    %34 = vector.load %arg4[%c0_43, %c1_44, %c0_45, %c0_46, %c0_47] : memref<1x4x4x8x8xf32, #tpu.memory_space<vmem>>, vector<1x1x1x8x8xf32>
    %35 = vector.shape_cast %34 : vector<1x1x1x8x8xf32> to vector<8x8xf32>
    %36 = vector.shape_cast %33 : vector<8x8xf32> to vector<1x1x1x8x8xf32>
    tpu.vector_store %arg4[%c0_43, %c1_44, %c0_45, %c0_46, %c0_47], %36 {strides = array<i32>} : memref<1x4x4x8x8xf32, #tpu.memory_space<vmem>>, vector<1x1x1x8x8xf32>,
    %c1_48 = arith.constant 1 : index
    %c0_49 = arith.constant 0 : index
    %37 = tpu.strided_load %arg5[%c1_48, %c0_49] {strides = array<i32: 2, 1>} : memref<16x8xf32, #tpu.memory_space<vmem>>, vector<8x8xf32>
    %38 = tpu.transpose %37, [1, 0] : vector<8x8xf32> -> vector<8x8xf32>
    %c0_50 = arith.constant 0 : index
    %c1_51 = arith.constant 1 : index
    %c1_52 = arith.constant 1 : index
    %c0_53 = arith.constant 0 : index
    %c0_54 = arith.constant 0 : index
    %39 = vector.load %arg4[%c0_50, %c1_51, %c1_52, %c0_53, %c0_54] : memref<1x4x4x8x8xf32, #tpu.memory_space<vmem>>, vector<1x1x1x8x8xf32>
    %40 = vector.shape_cast %39 : vector<1x1x1x8x8xf32> to vector<8x8xf32>
    %41 = vector.shape_cast %38 : vector<8x8xf32> to vector<1x1x1x8x8xf32>
    tpu.vector_store %arg4[%c0_50, %c1_51, %c1_52, %c0_53, %c0_54], %41 {strides = array<i32>} : memref<1x4x4x8x8xf32, #tpu.memory_space<vmem>>, vector<1x1x1x8x8xf32>,
    %c0_55 = arith.constant 0 : index
    %c1_56 = arith.constant 1 : index
    %c0_57 = arith.constant 0 : index
    %c16_58 = arith.constant 16 : index
    %42 = vector.load %arg3[%c0_55, %c1_56, %c0_57, %c16_58] : memref<1x4x8x32xf32, #tpu.memory_space<vmem>>, vector<1x1x8x16xf32>
    %43 = vector.shape_cast %42 : vector<1x1x8x16xf32> to vector<8x16xf32>
    %44 = tpu.transpose %43, [1, 0] : vector<8x16xf32> -> vector<16x8xf32>
    %c0_59 = arith.constant 0 : index
    %c0_60 = arith.constant 0 : index
    %45 = vector.load %arg5[%c0_59, %c0_60] : memref<16x8xf32, #tpu.memory_space<vmem>>, vector<16x8xf32>
    tpu.vector_store %arg5[%c0_59, %c0_60], %44 {strides = array<i32>} : memref<16x8xf32, #tpu.memory_space<vmem>>, vector<16x8xf32>,
    %c0_61 = arith.constant 0 : index
    %c0_62 = arith.constant 0 : index
    %46 = tpu.strided_load %arg5[%c0_61, %c0_62] {strides = array<i32: 2, 1>} : memref<16x8xf32, #tpu.memory_space<vmem>>, vector<8x8xf32>
    %47 = tpu.transpose %46, [1, 0] : vector<8x8xf32> -> vector<8x8xf32>
    %c0_63 = arith.constant 0 : index
    %c1_64 = arith.constant 1 : index
    %c2_65 = arith.constant 2 : index
    %c0_66 = arith.constant 0 : index
    %c0_67 = arith.constant 0 : index
    %48 = vector.load %arg4[%c0_63, %c1_64, %c2_65, %c0_66, %c0_67] : memref<1x4x4x8x8xf32, #tpu.memory_space<vmem>>, vector<1x1x1x8x8xf32>
    %49 = vector.shape_cast %48 : vector<1x1x1x8x8xf32> to vector<8x8xf32>
    %50 = vector.shape_cast %47 : vector<8x8xf32> to vector<1x1x1x8x8xf32>
    tpu.vector_store %arg4[%c0_63, %c1_64, %c2_65, %c0_66, %c0_67], %50 {strides = array<i32>} : memref<1x4x4x8x8xf32, #tpu.memory_space<vmem>>, vector<1x1x1x8x8xf32>,
    %c1_68 = arith.constant 1 : index
    %c0_69 = arith.constant 0 : index
    %51 = tpu.strided_load %arg5[%c1_68, %c0_69] {strides = array<i32: 2, 1>} : memref<16x8xf32, #tpu.memory_space<vmem>>, vector<8x8xf32>
    %52 = tpu.transpose %51, [1, 0] : vector<8x8xf32> -> vector<8x8xf32>
    %c0_70 = arith.constant 0 : index
    %c1_71 = arith.constant 1 : index
    %c3_72 = arith.constant 3 : index
    %c0_73 = arith.constant 0 : index
    %c0_74 = arith.constant 0 : index
    %53 = vector.load %arg4[%c0_70, %c1_71, %c3_72, %c0_73, %c0_74] : memref<1x4x4x8x8xf32, #tpu.memory_space<vmem>>, vector<1x1x1x8x8xf32>
    %54 = vector.shape_cast %53 : vector<1x1x1x8x8xf32> to vector<8x8xf32>
    %55 = vector.shape_cast %52 : vector<8x8xf32> to vector<1x1x1x8x8xf32>
    tpu.vector_store %arg4[%c0_70, %c1_71, %c3_72, %c0_73, %c0_74], %55 {strides = array<i32>} : memref<1x4x4x8x8xf32, #tpu.memory_space<vmem>>, vector<1x1x1x8x8xf32>,
    %c0_75 = arith.constant 0 : index
    %c2_76 = arith.constant 2 : index
    %c0_77 = arith.constant 0 : index
    %c0_78 = arith.constant 0 : index
    %56 = vector.load %arg3[%c0_75, %c2_76, %c0_77, %c0_78] : memref<1x4x8x32xf32, #tpu.memory_space<vmem>>, vector<1x1x8x16xf32>
    %57 = vector.shape_cast %56 : vector<1x1x8x16xf32> to vector<8x16xf32>
    %58 = tpu.transpose %57, [1, 0] : vector<8x16xf32> -> vector<16x8xf32>
    %c0_79 = arith.constant 0 : index
    %c0_80 = arith.constant 0 : index
    %59 = vector.load %arg5[%c0_79, %c0_80] : memref<16x8xf32, #tpu.memory_space<vmem>>, vector<16x8xf32>
    tpu.vector_store %arg5[%c0_79, %c0_80], %58 {strides = array<i32>} : memref<16x8xf32, #tpu.memory_space<vmem>>, vector<16x8xf32>,
    %c0_81 = arith.constant 0 : index
    %c0_82 = arith.constant 0 : index
    %60 = tpu.strided_load %arg5[%c0_81, %c0_82] {strides = array<i32: 2, 1>} : memref<16x8xf32, #tpu.memory_space<vmem>>, vector<8x8xf32>
    %61 = tpu.transpose %60, [1, 0] : vector<8x8xf32> -> vector<8x8xf32>
    %c0_83 = arith.constant 0 : index
    %c2_84 = arith.constant 2 : index
    %c0_85 = arith.constant 0 : index
    %c0_86 = arith.constant 0 : index
    %c0_87 = arith.constant 0 : index
    %62 = vector.load %arg4[%c0_83, %c2_84, %c0_85, %c0_86, %c0_87] : memref<1x4x4x8x8xf32, #tpu.memory_space<vmem>>, vector<1x1x1x8x8xf32>
    %63 = vector.shape_cast %62 : vector<1x1x1x8x8xf32> to vector<8x8xf32>
    %64 = vector.shape_cast %61 : vector<8x8xf32> to vector<1x1x1x8x8xf32>
    tpu.vector_store %arg4[%c0_83, %c2_84, %c0_85, %c0_86, %c0_87], %64 {strides = array<i32>} : memref<1x4x4x8x8xf32, #tpu.memory_space<vmem>>, vector<1x1x1x8x8xf32>,
    %c1_88 = arith.constant 1 : index
    %c0_89 = arith.constant 0 : index
    %65 = tpu.strided_load %arg5[%c1_88, %c0_89] {strides = array<i32: 2, 1>} : memref<16x8xf32, #tpu.memory_space<vmem>>, vector<8x8xf32>
    %66 = tpu.transpose %65, [1, 0] : vector<8x8xf32> -> vector<8x8xf32>
    %c0_90 = arith.constant 0 : index
    %c2_91 = arith.constant 2 : index
    %c1_92 = arith.constant 1 : index
    %c0_93 = arith.constant 0 : index
    %c0_94 = arith.constant 0 : index
    %67 = vector.load %arg4[%c0_90, %c2_91, %c1_92, %c0_93, %c0_94] : memref<1x4x4x8x8xf32, #tpu.memory_space<vmem>>, vector<1x1x1x8x8xf32>
    %68 = vector.shape_cast %67 : vector<1x1x1x8x8xf32> to vector<8x8xf32>
    %69 = vector.shape_cast %66 : vector<8x8xf32> to vector<1x1x1x8x8xf32>
    tpu.vector_store %arg4[%c0_90, %c2_91, %c1_92, %c0_93, %c0_94], %69 {strides = array<i32>} : memref<1x4x4x8x8xf32, #tpu.memory_space<vmem>>, vector<1x1x1x8x8xf32>,
    %c0_95 = arith.constant 0 : index
    %c2_96 = arith.constant 2 : index
    %c0_97 = arith.constant 0 : index
    %c16_98 = arith.constant 16 : index
    %70 = vector.load %arg3[%c0_95, %c2_96, %c0_97, %c16_98] : memref<1x4x8x32xf32, #tpu.memory_space<vmem>>, vector<1x1x8x16xf32>
    %71 = vector.shape_cast %70 : vector<1x1x8x16xf32> to vector<8x16xf32>
    %72 = tpu.transpose %71, [1, 0] : vector<8x16xf32> -> vector<16x8xf32>
    %c0_99 = arith.constant 0 : index
    %c0_100 = arith.constant 0 : index
    %73 = vector.load %arg5[%c0_99, %c0_100] : memref<16x8xf32, #tpu.memory_space<vmem>>, vector<16x8xf32>
    tpu.vector_store %arg5[%c0_99, %c0_100], %72 {strides = array<i32>} : memref<16x8xf32, #tpu.memory_space<vmem>>, vector<16x8xf32>,
    %c0_101 = arith.constant 0 : index
    %c0_102 = arith.constant 0 : index
    %74 = tpu.strided_load %arg5[%c0_101, %c0_102] {strides = array<i32: 2, 1>} : memref<16x8xf32, #tpu.memory_space<vmem>>, vector<8x8xf32>
    %75 = tpu.transpose %74, [1, 0] : vector<8x8xf32> -> vector<8x8xf32>
    %c0_103 = arith.constant 0 : index
    %c2_104 = arith.constant 2 : index
    %c2_105 = arith.constant 2 : index
    %c0_106 = arith.constant 0 : index
    %c0_107 = arith.constant 0 : index
    %76 = vector.load %arg4[%c0_103, %c2_104, %c2_105, %c0_106, %c0_107] : memref<1x4x4x8x8xf32, #tpu.memory_space<vmem>>, vector<1x1x1x8x8xf32>
    %77 = vector.shape_cast %76 : vector<1x1x1x8x8xf32> to vector<8x8xf32>
    %78 = vector.shape_cast %75 : vector<8x8xf32> to vector<1x1x1x8x8xf32>
    tpu.vector_store %arg4[%c0_103, %c2_104, %c2_105, %c0_106, %c0_107], %78 {strides = array<i32>} : memref<1x4x4x8x8xf32, #tpu.memory_space<vmem>>, vector<1x1x1x8x8xf32>,
    %c1_108 = arith.constant 1 : index
    %c0_109 = arith.constant 0 : index
    %79 = tpu.strided_load %arg5[%c1_108, %c0_109] {strides = array<i32: 2, 1>} : memref<16x8xf32, #tpu.memory_space<vmem>>, vector<8x8xf32>
    %80 = tpu.transpose %79, [1, 0] : vector<8x8xf32> -> vector<8x8xf32>
    %c0_110 = arith.constant 0 : index
    %c2_111 = arith.constant 2 : index
    %c3_112 = arith.constant 3 : index
    %c0_113 = arith.constant 0 : index
    %c0_114 = arith.constant 0 : index
    %81 = vector.load %arg4[%c0_110, %c2_111, %c3_112, %c0_113, %c0_114] : memref<1x4x4x8x8xf32, #tpu.memory_space<vmem>>, vector<1x1x1x8x8xf32>
    %82 = vector.shape_cast %81 : vector<1x1x1x8x8xf32> to vector<8x8xf32>
    %83 = vector.shape_cast %80 : vector<8x8xf32> to vector<1x1x1x8x8xf32>
    tpu.vector_store %arg4[%c0_110, %c2_111, %c3_112, %c0_113, %c0_114], %83 {strides = array<i32>} : memref<1x4x4x8x8xf32, #tpu.memory_space<vmem>>, vector<1x1x1x8x8xf32>,
    %c0_115 = arith.constant 0 : index
    %c3_116 = arith.constant 3 : index
    %c0_117 = arith.constant 0 : index
    %c0_118 = arith.constant 0 : index
    %84 = vector.load %arg3[%c0_115, %c3_116, %c0_117, %c0_118] : memref<1x4x8x32xf32, #tpu.memory_space<vmem>>, vector<1x1x8x16xf32>
    %85 = vector.shape_cast %84 : vector<1x1x8x16xf32> to vector<8x16xf32>
    %86 = tpu.transpose %85, [1, 0] : vector<8x16xf32> -> vector<16x8xf32>
    %c0_119 = arith.constant 0 : index
    %c0_120 = arith.constant 0 : index
    %87 = vector.load %arg5[%c0_119, %c0_120] : memref<16x8xf32, #tpu.memory_space<vmem>>, vector<16x8xf32>
    tpu.vector_store %arg5[%c0_119, %c0_120], %86 {strides = array<i32>} : memref<16x8xf32, #tpu.memory_space<vmem>>, vector<16x8xf32>,
    %c0_121 = arith.constant 0 : index
    %c0_122 = arith.constant 0 : index
    %88 = tpu.strided_load %arg5[%c0_121, %c0_122] {strides = array<i32: 2, 1>} : memref<16x8xf32, #tpu.memory_space<vmem>>, vector<8x8xf32>
    %89 = tpu.transpose %88, [1, 0] : vector<8x8xf32> -> vector<8x8xf32>
    %c0_123 = arith.constant 0 : index
    %c3_124 = arith.constant 3 : index
    %c0_125 = arith.constant 0 : index
    %c0_126 = arith.constant 0 : index
    %c0_127 = arith.constant 0 : index
    %90 = vector.load %arg4[%c0_123, %c3_124, %c0_125, %c0_126, %c0_127] : memref<1x4x4x8x8xf32, #tpu.memory_space<vmem>>, vector<1x1x1x8x8xf32>
    %91 = vector.shape_cast %90 : vector<1x1x1x8x8xf32> to vector<8x8xf32>
    %92 = vector.shape_cast %89 : vector<8x8xf32> to vector<1x1x1x8x8xf32>
    tpu.vector_store %arg4[%c0_123, %c3_124, %c0_125, %c0_126, %c0_127], %92 {strides = array<i32>} : memref<1x4x4x8x8xf32, #tpu.memory_space<vmem>>, vector<1x1x1x8x8xf32>,
    %c1_128 = arith.constant 1 : index
    %c0_129 = arith.constant 0 : index
    %93 = tpu.strided_load %arg5[%c1_128, %c0_129] {strides = array<i32: 2, 1>} : memref<16x8xf32, #tpu.memory_space<vmem>>, vector<8x8xf32>
    %94 = tpu.transpose %93, [1, 0] : vector<8x8xf32> -> vector<8x8xf32>
    %c0_130 = arith.constant 0 : index
    %c3_131 = arith.constant 3 : index
    %c1_132 = arith.constant 1 : index
    %c0_133 = arith.constant 0 : index
    %c0_134 = arith.constant 0 : index
    %95 = vector.load %arg4[%c0_130, %c3_131, %c1_132, %c0_133, %c0_134] : memref<1x4x4x8x8xf32, #tpu.memory_space<vmem>>, vector<1x1x1x8x8xf32>
    %96 = vector.shape_cast %95 : vector<1x1x1x8x8xf32> to vector<8x8xf32>
    %97 = vector.shape_cast %94 : vector<8x8xf32> to vector<1x1x1x8x8xf32>
    tpu.vector_store %arg4[%c0_130, %c3_131, %c1_132, %c0_133, %c0_134], %97 {strides = array<i32>} : memref<1x4x4x8x8xf32, #tpu.memory_space<vmem>>, vector<1x1x1x8x8xf32>,
    %c0_135 = arith.constant 0 : index
    %c3_136 = arith.constant 3 : index
    %c0_137 = arith.constant 0 : index
    %c16_138 = arith.constant 16 : index
    %98 = vector.load %arg3[%c0_135, %c3_136, %c0_137, %c16_138] : memref<1x4x8x32xf32, #tpu.memory_space<vmem>>, vector<1x1x8x16xf32>
    %99 = vector.shape_cast %98 : vector<1x1x8x16xf32> to vector<8x16xf32>
    %100 = tpu.transpose %99, [1, 0] : vector<8x16xf32> -> vector<16x8xf32>
    %c0_139 = arith.constant 0 : index
    %c0_140 = arith.constant 0 : index
    %101 = vector.load %arg5[%c0_139, %c0_140] : memref<16x8xf32, #tpu.memory_space<vmem>>, vector<16x8xf32>
    tpu.vector_store %arg5[%c0_139, %c0_140], %100 {strides = array<i32>} : memref<16x8xf32, #tpu.memory_space<vmem>>, vector<16x8xf32>,
    %c0_141 = arith.constant 0 : index
    %c0_142 = arith.constant 0 : index
    %102 = tpu.strided_load %arg5[%c0_141, %c0_142] {strides = array<i32: 2, 1>} : memref<16x8xf32, #tpu.memory_space<vmem>>, vector<8x8xf32>
    %103 = tpu.transpose %102, [1, 0] : vector<8x8xf32> -> vector<8x8xf32>
    %c0_143 = arith.constant 0 : index
    %c3_144 = arith.constant 3 : index
    %c2_145 = arith.constant 2 : index
    %c0_146 = arith.constant 0 : index
    %c0_147 = arith.constant 0 : index
    %104 = vector.load %arg4[%c0_143, %c3_144, %c2_145, %c0_146, %c0_147] : memref<1x4x4x8x8xf32, #tpu.memory_space<vmem>>, vector<1x1x1x8x8xf32>
    %105 = vector.shape_cast %104 : vector<1x1x1x8x8xf32> to vector<8x8xf32>
    %106 = vector.shape_cast %103 : vector<8x8xf32> to vector<1x1x1x8x8xf32>
    tpu.vector_store %arg4[%c0_143, %c3_144, %c2_145, %c0_146, %c0_147], %106 {strides = array<i32>} : memref<1x4x4x8x8xf32, #tpu.memory_space<vmem>>, vector<1x1x1x8x8xf32>,
    %c1_148 = arith.constant 1 : index
    %c0_149 = arith.constant 0 : index
    %107 = tpu.strided_load %arg5[%c1_148, %c0_149] {strides = array<i32: 2, 1>} : memref<16x8xf32, #tpu.memory_space<vmem>>, vector<8x8xf32>
    %108 = tpu.transpose %107, [1, 0] : vector<8x8xf32> -> vector<8x8xf32>
    %c0_150 = arith.constant 0 : index
    %c3_151 = arith.constant 3 : index
    %c3_152 = arith.constant 3 : index
    %c0_153 = arith.constant 0 : index
    %c0_154 = arith.constant 0 : index
    %109 = vector.load %arg4[%c0_150, %c3_151, %c3_152, %c0_153, %c0_154] : memref<1x4x4x8x8xf32, #tpu.memory_space<vmem>>, vector<1x1x1x8x8xf32>
    %110 = vector.shape_cast %109 : vector<1x1x1x8x8xf32> to vector<8x8xf32>
    %111 = vector.shape_cast %108 : vector<8x8xf32> to vector<1x1x1x8x8xf32>
    tpu.vector_store %arg4[%c0_150, %c3_151, %c3_152, %c0_153, %c0_154], %111 {strides = array<i32>} : memref<1x4x4x8x8xf32, #tpu.memory_space<vmem>>, vector<1x1x1x8x8xf32>,
    return
  }
  func.func @transform_0(%arg0: i32, %arg1: i32, %arg2: i32) -> (i32, i32, i32, i32) {
    %c0_i32 = arith.constant 0 : i32
    %c0_i32_0 = arith.constant 0 : i32
    return %arg0, %arg1, %arg2, %c0_i32 : i32, i32, i32, i32
  }
  func.func @transform_1(%arg0: i32, %arg1: i32, %arg2: i32) -> (i32, i32, i32, i32, i32) {
    %c0_i32 = arith.constant 0 : i32
    %c0_i32_0 = arith.constant 0 : i32
    %c0_i32_1 = arith.constant 0 : i32
    return %arg0, %arg1, %c0_i32, %arg2, %c0_i32_0 : i32, i32, i32, i32, i32
  }
}

</mosaic_0001>

<bundles_post_ra>
// kernel: tpu_custom_call.1
= control target key start
LH: loop header
LB: loop body
LE: loop exit
PB: predicated region body
PF: predicated region fallthrough
CT: control target
= control target key end

     0   :  { %6 = vsyncpa [#allocation4], 0  ;;  %s1601_s0 = inlined_call_operand.hbm [shape: f32[2,4,8,32], index: 0, kind: input, shape index: {}]   ;;  %s1602_s1 = inlined_call_operand.hbm [shape: f32[2,4,4,8,8], index: 1, kind: output, shape index: {}]  }
   0x1   :  { %8 = vsyncpa [#allocation4 + $0x1], 0 }
   0x2   :  { %9 = vsyncpa [#allocation5], 0 }
   0x3   :  { %11 = vsyncpa [#allocation5 + $0x1], 0  ;;  %s1374_s6 = smov 0   ;;  %s1376_s7 = smov 0  }
   0x4   :  { %s1378_s8 = smov 0   ;;  %s1380_s9 = smov 0  }
   0x5   :  { %s1382_s10 = smov 0   ;;  %s1384_s11 = smov 0  }
   0x6 LB: > { %s1137_s12 = sadd.s32 4294967295, %s1355_s11   ;;  %s1138_s13 = sadd.s32 4294967294, %s1355_s11   ;;  %s1355_s11 = sphi %s1384_s11, %s17_s11   ;;  %s1351_s10 = sphi %s1382_s10, %s1617_s10   ;;  %s1347_s9 = sphi %s1380_s9, %s1616_s9   ;;  %s1343_s8 = sphi %s1378_s8, %s1615_s8   ;;  %s1339_s7 = sphi %s1376_s7, %s1614_s7   ;;  %s1335_s6 = sphi %s1374_s6, %s1613_s6  }
   0x7   : > { %s36_s14 = sadd.s32 1, %s1351_s10  ;;  %s47_s15 = sadd.s32 1, %s1343_s8 }
   0x8   : > { %p38_p0 = scmp.ge.s32.totalorder %s36_s14, 2  ;;  %p54_p1 = scmp.ne.s32.totalorder %s1343_s8, %s1339_s7 }
   0x9   : > { %p55_p2 = scmp.eq.s32.totalorder %s1355_s11, 0  ;;  %p60_p3 = scmp.ne.s32.totalorder %s1339_s7, %s1335_s6 }
   0xa   : > { %s1619_s14 = smov (%p38_p0, %s36_s14), 0  ;;  %p61_p5 = scmp.eq.s32.totalorder %s1137_s12, 0 }
   0xb   : > { %p1415_p4 = por %p55_p2, %p54_p1  ;;  %s40_s17 = ssub.s32 %s1351_s10, %s1619_s14 }
   0xc   : > { %p88_p6 = scmp.eq.s32.totalorder %s1137_s12, 1  ;;  %p45_p7 = scmp.eq.s32.totalorder %s40_s17, 0 }
   0xd   : > { %p1421_p8 = por %p61_p5, %p60_p3  ;;  %p94_p10 = scmp.eq.s32.totalorder %s1138_s13, 1 }
   0xe   : > { %p1425_p9 = por %p88_p6, %p54_p1  ;;  %p1187_p13 = scmp.lt.s32.totalorder %s1355_s11, 2 }
   0xf   : > { %s1430_s20 = scalar_select %p45_p7, %s1343_s8, %s47_s15  }
  0x10   : > { %s1606_s19 = scalar_select %p1425_p9, 1, 0 }
  0x11   : > { %p1432_p11 = por %p94_p10, %p60_p3  ;;  %s114_s22 = sand.u32 1, %s1343_s8  }
  0x12   : > { %s1141_s23 = sshll.u32 %s114_s22, 5  ;;  %s1173_s24 = sshll.u32 %s1351_s10, 9 }
  0x13   : > { %s1607_s21 = scalar_select %p1432_p11, 1, 0 }
  0x14   : > { %s1443_s27 = scalar_lea.hbm %s1601_s0, %s1173_s24  ;;  %s118_s28 = scalar_lea.vmem [#allocation3], %s1141_s23 }
  0x15   : > { %s128_s29 = sshll.u32 %s118_s28, 4  ;;  %p1449_p0 = pnand %p1187_p13, %p1415_p4  ;;  %s1445_s29 = int_to_ptr.vmem [resolvable:$true] %s128_s29 }
  0x16   : > { %s1454_s2 = scalar_lea.sflag [#allocation4], %s114_s22  ;;  %s1243_s3 = scalar_lea.hbm %s1443_s27, 512 }
  0x17   : > { %p1244_p2 = scmp.ne.s32.totalorder %s1443_s27, %s1243_s3  ;;  %p1245_p3 = pneg %p1449_p0 }
  0x18   : > { %s1248_s12 = scalar_lea.hbm %s1601_s0, 1024  ;;  %p1249_p4 = scmp.lt.u32.totalorder %s1443_s27, %s1601_s0 }
  0x19   : > { %p1246_p5 = pnand %p1245_p3, %p1244_p2  ;;  %p1250_p7 = scmp.lt.u32.totalorder %s1248_s12, %s1243_s3 }
  0x1a   : > { %p1252_p13 = scmp.lt.u32.totalorder %s1243_s3, %s1443_s27 }
  0x1b   : > { %p1247_p6 = pneg %p1246_p5  ;;  %p1251_p10 = por %p1250_p7, %p1249_p4 }
  0x1d   : > { %p1253_p12 = por %p1252_p13, %p1251_p10 }
  0x1f   : > { %p1254_p1 = pnand %p1253_p12, %p1247_p6 }
  0x21   : > { %1257 = shalt.err (!%p1254_p1)
}
  0x22   : > { %s1258_s16 = scalar_lea.vmem %s1445_s29, 512  ;;  %s1357_s17 = smov [#allocation3]  }
  0x23   : > { %p1259_p2 = scmp.ne.s32.totalorder %s1445_s29, %s1258_s16  ;;  %s1263_s22 = sshll.u32 %s1357_s17, 4  ;;  %s1264_s22 = int_to_ptr.vmem [resolvable:$false] %s1263_s22 }
  0x24   : > { %s1265_s23 = scalar_lea.vmem %s1264_s22, 1024  ;;  %p1266_p9 = scmp.lt.s32.totalorder %s1445_s29, %s1264_s22 }
  0x25   : > { %p1261_p5 = pnand %p1259_p2, %p1245_p3  ;;  %p1267_p4 = scmp.lt.s32.totalorder %s1265_s23, %s1258_s16 }
  0x27   : > { %p1262_p11 = pneg %p1261_p5  ;;  %p1268_p7 = por %p1267_p4, %p1266_p9 }
  0x29   : > { %p1269_p10 = pnand %p1268_p7, %p1262_p11 }
  0x2b   : > { %1272 = shalt.err (!%p1269_p10)
}
  0x2c   : > { %s1358_s24 = smov 128   ;;  %s1359_s25 = smov 8  }
  0x2d   : > { %1182 = dma.hbm_to_vmem [thread:$0]  (!%p1449_p0), %s1443_s27, 512, %s1445_s29, %s1454_s2, %s1358_s24, %s1358_s24, %s1359_s25  }
  0x2e   : > { %p136_p12 = scmp.lt.s32.totalorder %s1355_s11, 3  ;;  %p1609_p1 = scmp.ge.s32.totalorder %s1355_s11, 1 }
  0x30   : > { %p137_p3 = pnand %p1609_p1, %p136_p12 }
  0x31   : > { %s1486_s26 = sand.u32 (!%p137_p3), 1, %s1339_s7  }
  0x32   : > { %140 = sbr.rel (%p137_p3) target bundleno = 567 (0x237), region = 24  ;;  %s1145_s28 = sshll.u32 (!%p137_p3), %s1486_s26, 5 }
  0x33   : > { %s143_s3 = scalar_lea.sflag (!%p137_p3), [#allocation4], %s1486_s26  ;;  %s146_s4 = scalar_lea.vmem (!%p137_p3), [#allocation3], %s1145_s28 }
  0x39   : > { %1326 = dma.done.wait (%p1421_p8), %s143_s3, 512  }
  0x3a   : > { %1328 = vsyncadd (%p1421_p8), %s143_s3, 4294966784  ;;  %v1159_v0 = vld [vmem:[%s146_s4 + $0x10] sm:$0xff]  ;;  %v167_v1 = vld [vmem:[%s146_s4] sm:$0xff]  ;;  %s1360_s27 = smov 112   ;;  %vm200_vm0 = vcmask 64512   ;;  %s1146_s18 = sshll.u32 %s1486_s26, 7 }
  0x3b   : > { %705 = vrot.lane.b32.xlu0 %v1159_v0, %s1360_s27  ;;  %275 = vrot.lane.b32.xlu1 %v167_v1, %s1360_s27  ;;  %v1153_v2 = vld [vmem:[%s146_s4 + $0x8] sm:$0xff]  ;;  %v1165_v3 = vld [vmem:[%s146_s4 + $0x18] sm:$0xff]  ;;  %s1497_s29 = scalar_lea.vmem [#allocation6], %s1146_s18  ;;  %s1174_s30 = sshll.u32 %s1347_s9, 11 }
  0x3c   : > { %s1045_s2 = sshll.u32 %s1497_s29, 4  ;;  %s1546_s13 = scalar_lea.hbm %s1602_s1, %s1174_s30  ;;  %s1548_s2 = int_to_ptr.vmem [resolvable:$true] %s1045_s2 }
  0x3d   : > { %s1028_s15 = scalar_lea.sflag [#allocation5], %s1486_s26  ;;  %s1273_s16 = scalar_lea.vmem %s1548_s2, 2048 }
  0x3e   : > { %p1274_p8 = scmp.ne.s32.totalorder %s1548_s2, %s1273_s16  ;;  %p1610_p9 = scmp.ne.s32.totalorder %s1606_s19, 0 }
  0x3f   : > { %490 = vrot.lane.b32.xlu1 %v1153_v2, %s1360_s27  ;;  %s1361_s9 = smov [#allocation6]  }
  0x40   : > { %p1275_p11 = pnand %p1274_p8, %p1610_p9  ;;  %s1277_s17 = sshll.u32 %s1361_s9, 4  ;;  %s1278_s17 = int_to_ptr.vmem [resolvable:$false] %s1277_s17 }
  0x41   : > { %s1279_s22 = scalar_lea.vmem %s1278_s17, 4096  ;;  %p1280_p6 = scmp.lt.s32.totalorder %s1548_s2, %s1278_s17 }
  0x42   : > { %p1276_p0 = pneg %p1275_p11  ;;  %p1281_p13 = scmp.lt.s32.totalorder %s1279_s22, %s1273_s16 }
  0x43   : > { %920 = vrot.lane.b32.xlu1 %v1165_v3, %s1360_s27 }
  0x44   : > { %p1282_p2 = por %p1281_p13, %p1280_p6 }
  0x46   : > { %p1283_p5 = pnand %p1282_p2, %p1276_p0 }
  0x59   : > { %168 = vxpose.xlu0.b32.start.end [1/1] (short) (narrow) %v167_v1, 16 }
  0xad   : > { %v706_v4 = vpop.permute.xlu0 %705  ;;  %v276_v9 = vpop.permute.xlu1 %275 }
  0xb1   : > { %v491_v10 = vpop.permute.xlu1 %490 }
  0xb5   : > { %v921_v11 = vpop.permute.xlu1 %920 }
  0xd9   : > { %v184_v5 = vpop.trf.xlu0 }
  0xda   : > { %201 = vst.msk [vmem:[#allocation2] sm:$0xff] %vm200_vm0, %v184_v5 }
  0xdd   : > { %v185_v6 = vpop.trf.xlu0 }
  0xde   : > { %202 = vst.msk [vmem:[#allocation2 + $0x8] sm:$0xff] %vm200_vm0, %v185_v6 }
  0xe5   : > { %v203_v7 = vld [vmem:[#allocation2] ss:$2 sm:$0xff]  ;;  %v238_v8 = vld [vmem:[#allocation2 + $0x1] ss:$2 sm:$0xff] }
  0xe6   : > { %239 = vxpose.xlu1.b32.start.end [1/1] (short) (narrow) %v238_v8, 8  ;;  %204 = vxpose.xlu0.b32.start.end [1/1] (short) (narrow) %v203_v7, 8 }
  0xea   : > { %278 = vxpose.xlu0.b32.start.end [1/1] (short) (narrow) %v276_v9, 16  ;;  %384 = vxpose.xlu1.b32.start.end [1/1] (short) (narrow) %v1153_v2, 16 }
  0xef   : > { %493 = vxpose.xlu0.b32.start.end [1/1] (short) (narrow) %v491_v10, 16 }
  0xf4   : > { %599 = vxpose.xlu0.b32.start.end [1/1] (short) (narrow) %v1159_v0, 16 }
  0xf9   : > { %708 = vxpose.xlu0.b32.start.end [1/1] (short) (narrow) %v706_v4, 16 }
  0xfe   : > { %814 = vxpose.xlu0.b32.start.end [1/1] (short) (narrow) %v1165_v3, 16 }
 0x103   : > { %923 = vxpose.xlu0.b32.start.end [1/1] (short) (narrow) %v921_v11, 16 }
 0x166   : > { %v220_v12 = vpop.trf.xlu0  ;;  %v255_v13 = vpop.trf.xlu1 }
 0x167   : > { %236 = vst.msk [vmem:[%s1497_s29] sm:$0xff] %vm200_vm0, %v220_v12  ;;  %1147 = vst.msk [vmem:[%s1497_s29 + $0x8] sm:$0xff] %vm200_vm0, %v255_v13 }
 0x16a   : > { %v294_v14 = vpop.trf.xlu0  ;;  %v400_v16 = vpop.trf.xlu1 }
 0x16b   : > { %310 = vst.msk [vmem:[#allocation2] sm:$0xff] %vm200_vm0, %v294_v14 }
 0x16e   : > { %v295_v15 = vpop.trf.xlu0  ;;  %v401_v18 = vpop.trf.xlu1 }
 0x16f   : > { %311 = vst.msk [vmem:[#allocation2 + $0x8] sm:$0xff] %vm200_vm0, %v295_v15 }
 0x172   : > { %v509_v17 = vpop.trf.xlu0 }
 0x176   : > { %v312_v19 = vld [vmem:[#allocation2] ss:$2 sm:$0xff]  ;;  %v347_v20 = vld [vmem:[#allocation2 + $0x1] ss:$2 sm:$0xff]  ;;  %v510_v21 = vpop.trf.xlu0 }
 0x177   : > { %416 = vst.msk [vmem:[#allocation2] sm:$0xff] %vm200_vm0, %v400_v16  ;;  %417 = vst.msk [vmem:[#allocation2 + $0x8] sm:$0xff] %vm200_vm0, %v401_v18  ;;  %313 = vxpose.xlu0.b32.start.end [1/1] (short) (narrow) %v312_v19, 8 }
 0x17a   : > { %v615_v22 = vpop.trf.xlu0 }
 0x17b   : > { %348 = vxpose.xlu0.b32.start.end [1/1] (short) (narrow) %v347_v20, 8 }
 0x17e   : > { %v418_v23 = vld [vmem:[#allocation2] ss:$2 sm:$0xff]  ;;  %v453_v24 = vld [vmem:[#allocation2 + $0x1] ss:$2 sm:$0xff]  ;;  %v616_v25 = vpop.trf.xlu0 }
 0x17f   : > { %525 = vst.msk [vmem:[#allocation2] sm:$0xff] %vm200_vm0, %v509_v17  ;;  %526 = vst.msk [vmem:[#allocation2 + $0x8] sm:$0xff] %vm200_vm0, %v510_v21  ;;  %419 = vxpose.xlu0.b32.start.end [1/1] (short) (narrow) %v418_v23, 8 }
 0x182   : > { %v724_v26 = vpop.trf.xlu0 }
 0x183   : > { %454 = vxpose.xlu0.b32.start.end [1/1] (short) (narrow) %v453_v24, 8 }
 0x186   : > { %v527_v27 = vld [vmem:[#allocation2] ss:$2 sm:$0xff]  ;;  %v562_v28 = vld [vmem:[#allocation2 + $0x1] ss:$2 sm:$0xff]  ;;  %v725_v29 = vpop.trf.xlu0 }
 0x187   : > { %528 = vxpose.xlu0.b32.start.end [1/1] (short) (narrow) %v527_v27, 8  ;;  %631 = vst.msk [vmem:[#allocation2] sm:$0xff] %vm200_vm0, %v615_v22  ;;  %632 = vst.msk [vmem:[#allocation2 + $0x8] sm:$0xff] %vm200_vm0, %v616_v25 }
 0x18a   : > { %v830_v30 = vpop.trf.xlu0 }
 0x18b   : > { %563 = vxpose.xlu0.b32.start.end [1/1] (short) (narrow) %v562_v28, 8 }
 0x18e   : > { %v633_v31 = vld [vmem:[#allocation2] ss:$2 sm:$0xff]  ;;  %v668_v32 = vld [vmem:[#allocation2 + $0x1] ss:$2 sm:$0xff]  ;;  %v831_v33 = vpop.trf.xlu0 }
 0x18f   : > { %634 = vxpose.xlu1.b32.start.end [1/1] (short) (narrow) %v633_v31, 8  ;;  %740 = vst.msk [vmem:[#allocation2] sm:$0xff] %vm200_vm0, %v724_v26  ;;  %741 = vst.msk [vmem:[#allocation2 + $0x8] sm:$0xff] %vm200_vm0, %v725_v29 }
 0x192   : > { %v939_v36 = vpop.trf.xlu0 }
 0x193   : > { %669 = vxpose.xlu1.b32.start.end [1/1] (short) (narrow) %v668_v32, 8 }
 0x196   : > { %v777_v34 = vld [vmem:[#allocation2 + $0x1] ss:$2 sm:$0xff]  ;;  %v742_v35 = vld [vmem:[#allocation2] ss:$2 sm:$0xff]  ;;  %v940_v37 = vpop.trf.xlu0 }
 0x197   : > { %778 = vxpose.xlu1.b32.start.end [1/1] (short) (narrow) %v777_v34, 8  ;;  %743 = vxpose.xlu0.b32.start.end [1/1] (short) (narrow) %v742_v35, 8  ;;  %846 = vst.msk [vmem:[#allocation2] sm:$0xff] %vm200_vm0, %v830_v30  ;;  %847 = vst.msk [vmem:[#allocation2 + $0x8] sm:$0xff] %vm200_vm0, %v831_v33 }
 0x19e   : > { %v883_v38 = vld [vmem:[#allocation2 + $0x1] ss:$2 sm:$0xff]  ;;  %v848_v39 = vld [vmem:[#allocation2] ss:$2 sm:$0xff] }
 0x19f   : > { %884 = vxpose.xlu0.b32.start.end [1/1] (short) (narrow) %v883_v38, 8  ;;  %849 = vxpose.xlu1.b32.start.end [1/1] (short) (narrow) %v848_v39, 8  ;;  %955 = vst.msk [vmem:[#allocation2] sm:$0xff] %vm200_vm0, %v939_v36  ;;  %956 = vst.msk [vmem:[#allocation2 + $0x8] sm:$0xff] %vm200_vm0, %v940_v37 }
 0x1a6   : > { %v992_v40 = vld [vmem:[#allocation2 + $0x1] ss:$2 sm:$0xff]  ;;  %v957_v41 = vld [vmem:[#allocation2] ss:$2 sm:$0xff] }
 0x1a7   : > { %993 = vxpose.xlu0.b32.start.end [1/1] (short) (narrow) %v992_v40, 8  ;;  %958 = vxpose.xlu1.b32.start.end [1/1] (short) (narrow) %v957_v41, 8 }
 0x1f7   : > { %v329_v42 = vpop.trf.xlu0 }
 0x1f8   : > { %1148 = vst.msk [vmem:[%s1497_s29 + $0x10] sm:$0xff] %vm200_vm0, %v329_v42 }
 0x1fb   : > { %v364_v43 = vpop.trf.xlu0 }
 0x1fc   : > { %1149 = vst.msk [vmem:[%s1497_s29 + $0x18] sm:$0xff] %vm200_vm0, %v364_v43 }
 0x1ff   : > { %v435_v44 = vpop.trf.xlu0 }
 0x200   : > { %1151 = vst.msk [vmem:[%s1497_s29 + $0x20] sm:$0xff] %vm200_vm0, %v435_v44 }
 0x203   : > { %v470_v45 = vpop.trf.xlu0 }
 0x204   : > { %1152 = vst.msk [vmem:[%s1497_s29 + $0x28] sm:$0xff] %vm200_vm0, %v470_v45 }
 0x207   : > { %v544_v46 = vpop.trf.xlu0 }
 0x208   : > { %1154 = vst.msk [vmem:[%s1497_s29 + $0x30] sm:$0xff] %vm200_vm0, %v544_v46 }
 0x20b   : > { %v579_v47 = vpop.trf.xlu0 }
 0x20c   : > { %1155 = vst.msk [vmem:[%s1497_s29 + $0x38] sm:$0xff] %vm200_vm0, %v579_v47 }
 0x20f   : > { %v650_v48 = vpop.trf.xlu1 }
 0x210   : > { %1157 = vst.msk [vmem:[%s1497_s29 + $0x40] sm:$0xff] %vm200_vm0, %v650_v48 }
 0x213   : > { %v685_v49 = vpop.trf.xlu1 }
 0x214   : > { %1158 = vst.msk [vmem:[%s1497_s29 + $0x48] sm:$0xff] %vm200_vm0, %v685_v49 }
 0x217   : > { %v794_v50 = vpop.trf.xlu1  ;;  %v759_v51 = vpop.trf.xlu0 }
 0x218   : > { %1161 = vst.msk [vmem:[%s1497_s29 + $0x58] sm:$0xff] %vm200_vm0, %v794_v50  ;;  %1160 = vst.msk [vmem:[%s1497_s29 + $0x50] sm:$0xff] %vm200_vm0, %v759_v51 }
 0x21f   : > { %v865_v52 = vpop.trf.xlu1  ;;  %v900_v53 = vpop.trf.xlu0 }
 0x220   : > { %1163 = vst.msk [vmem:[%s1497_s29 + $0x60] sm:$0xff] %vm200_vm0, %v865_v52  ;;  %1164 = vst.msk [vmem:[%s1497_s29 + $0x68] sm:$0xff] %vm200_vm0, %v900_v53 }
 0x227   : > { %v974_v54 = vpop.trf.xlu1  ;;  %v1009_v55 = vpop.trf.xlu0 }
 0x228   : > { %1166 = vst.msk [vmem:[%s1497_s29 + $0x70] sm:$0xff] %vm200_vm0, %v974_v54  ;;  %1167 = vst.msk [vmem:[%s1497_s29 + $0x78] sm:$0xff] %vm200_vm0, %v1009_v55 }
 0x229   : > { %1286 = shalt.err (!%p1283_p5)
}
 0x22a   : > { %s1287_s23 = scalar_lea.hbm %s1546_s13, 2048  ;;  %s1291_s28 = scalar_lea.hbm %s1602_s1, 4096 }
 0x22b   : > { %p1288_p4 = scmp.ne.s32.totalorder %s1546_s13, %s1287_s23  ;;  %p1292_p12 = scmp.lt.u32.totalorder %s1546_s13, %s1602_s1 }
 0x22c   : > { %p1293_p1 = scmp.lt.u32.totalorder %s1291_s28, %s1287_s23  ;;  %p1295_p8 = scmp.lt.u32.totalorder %s1287_s23, %s1546_s13 }
 0x22d   : > { %p1289_p7 = pnand %p1288_p4, %p1610_p9 }
 0x22e   : > { %p1294_p3 = por %p1293_p1, %p1292_p12 }
 0x22f   : > { %p1290_p10 = pneg %p1289_p7 }
 0x230   : > { %p1296_p11 = por %p1295_p8, %p1294_p3 }
 0x232   : > { %p1297_p0 = pnand %p1296_p11, %p1290_p10 }
 0x234   : > { %1300 = shalt.err (!%p1297_p0)
}
 0x235   : > { %s1362_s27 = smov 128   ;;  %s1363_s18 = smov 8  }
 0x236   : > { %1177 = dma.vmem_to_hbm [thread:$0]  (%p1610_p9), %s1548_s2, 2048, %s1546_s13, %s1028_s15, %s1362_s27, %s1362_s27, %s1363_s18  }
 0x237 PF: > { %s1060_s29 = sand.u32 1, %s1335_s6   ;;  %p1611_p6 = scmp.ne.s32.totalorder %s1607_s21, 0 }
 0x238   : > { %p1612_p13 = scmp.ge.s32.totalorder %s1355_s11, 2  ;;  %s1061_s30 = scalar_lea.sflag [#allocation5], %s1060_s29 }
 0x23a   : > { %p1184_p2 = pnand %p1612_p13, %p1611_p6 }
 0x23c   : > { %1330 = dma.done.wait (!%p1184_p2), %s1061_s30, 2048  }
 0x23d   : > { %1332 = vsyncadd (!%p1184_p2), %s1061_s30, 4294965248  ;;  %s17_s11 = sadd.s32 1, %s1355_s11   ;;  %s1613_s6 = smov %s1339_s7 }
 0x23e   : > { %p14_p5 = scmp.ge.s32.totalorder %s17_s11, 4   ;;  %s1614_s7 = smov %s1343_s8 }
 0x23f   : > { %s1615_s8 = smov %s1430_s20  ;;  %s1616_s9 = smov %s1351_s10 }
 0x240   : > { %s1617_s10 = smov %s1619_s14  ;;  %16 = sbr.rel (!%p14_p5) target bundleno = 6 (0x6), region = 88 }
 0x247   :  { %1066 = vsyncpa [#allocation4], 1 }
 0x248   :  { %1068 = vsyncpa [#allocation4 + $0x1], 1 }
 0x249   :  { %1069 = vsyncpa [#allocation5], 1 }
 0x24a   :  { %1071 = vsyncpa [#allocation5 + $0x1], 1 }

</bundles_post_ra>
